<compile_context>
chip_gen: v7x
topology: tpu7x:2x2x1
jax: 0.10.0
libtpu: 0.0.40
codegen_flags: <defaults>
</compile_context>

<pallas_src>
import math
import functools

import numpy as np
import jax
import jax.numpy as jnp
from jax.experimental import pallas as pl
from jax.experimental.pallas import tpu as pltpu


ROW_TILE = 8  # f32 sublane height; use 128/256 per-tile rows for large trees


# ----------------------------------------------------------------------------
# Pallas kernel: one row-tile of nodes (all of the same tree level).
# ----------------------------------------------------------------------------
def _tree_kernel(x_ref, a_ref, w_ref, b_ref, out_ref, h_state, c_state):
    t = pl.program_id(0)
    tile = x_ref.shape[0]
    hid = h_state.shape[1]

    # Zero the whole-tree h/c state once (also guarantees padding rows are 0,
    # so the adjacency matmul never touches garbage).
    @pl.when(t == 0)
    def _init():
        h_state[...] = jnp.zeros_like(h_state)
        c_state[...] = jnp.zeros_like(c_state)

    # child_h_sum / child_c_sum via 0/1 adjacency matmul against the states
    # of already-processed (lower-level) nodes resident in VMEM scratch.
    hsum = jnp.dot(a_ref[...], h_state[...], preferred_element_type=jnp.float32)
    csum = jnp.dot(a_ref[...], c_state[...], preferred_element_type=jnp.float32)

    # Fused gate projection: iou = [x, child_h_sum] @ [Wx; Wh] + (bx + bh)
    xh = jnp.concatenate([x_ref[...], hsum], axis=1)          # (tile, D+H)
    iou = jnp.dot(xh, w_ref[...], preferred_element_type=jnp.float32) + b_ref[...]

    # Single vectorized activation pass over the 4H gate block.
    # Gate order matches torch.split: [i, o, u, f]; only u gets tanh.
    col = jax.lax.broadcasted_iota(jnp.int32, iou.shape, 1)
    is_u = jnp.logical_and(col >= 2 * hid, col < 3 * hid)
    act = jnp.where(is_u, jnp.tanh(iou), jax.nn.sigmoid(iou))

    i_g = act[:, 0 * hid:1 * hid]
    o_g = act[:, 1 * hid:2 * hid]
    u_g = act[:, 2 * hid:3 * hid]
    f_g = act[:, 3 * hid:4 * hid]

    # c = i*u + sum_k f*child_c[k] = i*u + f*child_c_sum ;  h = o*tanh(c)
    c_new = i_g * u_g + f_g * csum
    h_new = o_g * jnp.tanh(c_new)

    # Persist this tile's states so later (higher) levels can consume them.
    row0 = pl.multiple_of(t * tile, tile)
    h_state[pl.ds(row0, tile), :] = h_new
    c_state[pl.ds(row0, tile), :] = c_new

    # Lane-dense output slab [h | c | 0-pad] -> one unmasked full-width store.
    pad = out_ref.shape[1] - 2 * hid
    pieces = [h_new, c_new]
    if pad > 0:
        pieces.append(jnp.zeros((tile, pad), jnp.float32))
    out_ref[...] = jnp.concatenate(pieces, axis=1)


# ----------------------------------------------------------------------------
# One pallas_call for the whole (flattened) tree.
# ----------------------------------------------------------------------------
@functools.partial(jax.jit, static_argnames=("tile",))
def _tree_lstm_batched(w, b, x, a, *, tile):
    n_rows, d_in = x.shape
    hid = w.shape[1] // 4
    out_w = pl.cdiv(2 * hid, 128) * 128          # lane-dense output width
    grid = (n_rows // tile,)

    return pl.pallas_call(
        _tree_kernel,
        out_shape=jax.ShapeDtypeStruct((n_rows, out_w), jnp.float32),
        grid_spec=pltpu.PrefetchScalarGridSpec(
            num_scalar_prefetch=0,
            grid=grid,
            in_specs=[
                pl.BlockSpec((tile, d_in), lambda t: (t, 0)),            # X tile
                pl.BlockSpec((tile, n_rows), lambda t: (t, 0)),          # adjacency tile
                pl.BlockSpec((d_in + hid, 4 * hid), lambda t: (0, 0)),   # fused W: DMA'd once
                pl.BlockSpec((1, 4 * hid), lambda t: (0, 0)),            # fused bias: DMA'd once
            ],
            out_specs=pl.BlockSpec((tile, out_w), lambda t: (t, 0)),
            scratch_shapes=[
                pltpu.VMEM((n_rows, hid), jnp.float32),   # h state for all nodes
                pltpu.VMEM((n_rows, hid), jnp.float32),   # c state for all nodes
            ],
        ),
        compiler_params=pltpu.CompilerParams(
            # Grid steps are level-ordered and carry a dependency (parents read
            # children's scratch state), so this axis must stay sequential.
            dimension_semantics=("arbitrary",),
        ),
    )(x, a, w, b)


# ----------------------------------------------------------------------------
# Host-side tree machinery: flatten the recursion into a level schedule.
# ----------------------------------------------------------------------------
class Node:
    def __init__(self, embedding, children=()):
        self.embedding = embedding          # (1, input_dim)
        self.children = list(children)


def _levels_bottom_up(root):
    levels = {}

    def rec(node):
        lvl = 0 if not node.children else 1 + max(rec(ch) for ch in node.children)
        levels.setdefault(lvl, []).append(node)
        return lvl

    rec(root)
    return [levels.get(l, []) for l in range(max(levels) + 1)]


def _build_schedule(root, input_dim, tile):
    """Level-ordered rows (each level padded to a full tile) + child adjacency."""
    levels = _levels_bottom_up(root)
    row_of = {}
    row = 0
    for nodes in levels:
        for nd in nodes:
            row_of[id(nd)] = row
            row += 1
        row = ((row + tile - 1) // tile) * tile   # pad level -> tiles never mix levels
    n_rows = max(row, tile)

    x = np.zeros((n_rows, input_dim), np.float32)
    adj = np.zeros((n_rows, n_rows), np.float32)
    for nodes in levels:
        for nd in nodes:
            r = row_of[id(nd)]
            x[r, :] = np.asarray(nd.embedding, np.float32).reshape(-1)
            for ch in nd.children:
                adj[r, row_of[id(ch)]] = 1.0
    return jnp.asarray(x), jnp.asarray(adj), row_of[id(root)]


def pack_params(params):
    w = jnp.concatenate([params["wx"], params["wh"]], axis=0)   # (D+H, 4H)
    b = params["bx"] + params["bh"]                             # (1, 4H)
    return w, b


def tree_lstm_forward(params, root, tile=ROW_TILE):
    # TODO(synk): the tree flattening itself (data-dependent Python recursion)
    # stays on the host; all per-node math runs inside one pallas_call.
    d_in = params["wx"].shape[0]
    hid = params["wh"].shape[0]
    w, b = pack_params(params)
    x, adj, root_row = _build_schedule(root, d_in, tile)
    out = _tree_lstm_batched(w, b, x, adj, tile=tile)
    h = out[root_row:root_row + 1, 0:hid]
    c = out[root_row:root_row + 1, hid:2 * hid]
    return h, c


# ----------------------------------------------------------------------------
# Pure-JAX reference (mirrors the PyTorch module exactly) for a sanity check.
# ----------------------------------------------------------------------------
def node_forward_ref(params, x, hsum, csum):
    H = params["wh"].shape[0]
    iou = x @ params["wx"] + params["bx"] + hsum @ params["wh"] + params["bh"]
    i = jax.nn.sigmoid(iou[:, 0 * H:1 * H])
    o = jax.nn.sigmoid(iou[:, 1 * H:2 * H])
    u = jnp.tanh(iou[:, 2 * H:3 * H])
    f = jax.nn.sigmoid(iou[:, 3 * H:4 * H])
    c = i * u + f * csum
    h = o * jnp.tanh(c)
    return h, c


def tree_lstm_forward_ref(params, root):
    H = params["wh"].shape[0]
    child_states = [tree_lstm_forward_ref(params, ch) for ch in root.children]
    if child_states:
        hsum = jnp.sum(jnp.concatenate([s[0] for s in child_states], 0), 0, keepdims=True)
        csum = jnp.sum(jnp.concatenate([s[1] for s in child_states], 0), 0, keepdims=True)
    else:
        hsum = jnp.zeros((1, H), jnp.float32)
        csum = jnp.zeros((1, H), jnp.float32)
    return node_forward_ref(params, root.embedding, hsum, csum)


# ----------------------------------------------------------------------------
# Deterministic parameter init (PyTorch nn.Linear style).
# ----------------------------------------------------------------------------
def init_params(key, input_dim, hidden_dim):
    k1, k2, k3, k4 = jax.random.split(key, 4)
    bx_bound = 1.0 / math.sqrt(input_dim)
    bh_bound = 1.0 / math.sqrt(hidden_dim)
    return {
        "wx": jax.random.uniform(k1, (input_dim, 4 * hidden_dim), jnp.float32,
                                 -bx_bound, bx_bound),
        "bx": jax.random.uniform(k2, (1, 4 * hidden_dim), jnp.float32,
                                 -bx_bound, bx_bound),
        "wh": jax.random.uniform(k3, (hidden_dim, 4 * hidden_dim), jnp.float32,
                                 -bh_bound, bh_bound),
        "bh": jax.random.uniform(k4, (1, 4 * hidden_dim), jnp.float32,
                                 -bh_bound, bh_bound),
    }


if __name__ == "__main__":
    INPUT_DIM = 32
    HIDDEN_DIM = 32

    key = jax.random.PRNGKey(0)
    pkey, ekey1, ekey2 = jax.random.split(key, 3)
    params = init_params(pkey, INPUT_DIM, HIDDEN_DIM)

    # ---- Tree 1: small, as before ------------------------------------------
    #        root
    #       /    \
    #     n1      n2
    #    /  \
    #  leafA leafB
    emb_keys = jax.random.split(ekey1, 5)
    embs = [jax.random.normal(k, (1, INPUT_DIM), jnp.float32) for k in emb_keys]
    leaf_a = Node(embs[0])
    leaf_b = Node(embs[1])
    n1 = Node(embs[2], [leaf_a, leaf_b])
    n2 = Node(embs[3])
    root1 = Node(embs[4], [n1, n2])

    h1, c1 = tree_lstm_forward(params, root1)
    h1 = jax.block_until_ready(h1)
    c1 = jax.block_until_ready(c1)
    h1_ref, c1_ref = tree_lstm_forward_ref(params, root1)
    assert h1.shape == (1, HIDDEN_DIM) and c1.shape == (1, HIDDEN_DIM)
    assert jnp.allclose(h1, h1_ref, atol=1e-4, rtol=1e-4)
    assert jnp.allclose(c1, c1_ref, atol=1e-4, rtol=1e-4)

    # ---- Tree 2: wider/deeper, exercises multi-tile levels ------------------
    emb_keys2 = jax.random.split(ekey2, 14)
    embs2 = [jax.random.normal(k, (1, INPUT_DIM), jnp.float32) for k in emb_keys2]
    leaves = [Node(e) for e in embs2[:10]]
    mids = [Node(embs2[10], leaves[0:4]),
            Node(embs2[11], leaves[4:7]),
            Node(embs2[12], leaves[7:10])]
    root2 = Node(embs2[13], mids)

    h2, c2 = tree_lstm_forward(params, root2)
    h2 = jax.block_until_ready(h2)
    c2 = jax.block_until_ready(c2)
    h2_ref, c2_ref = tree_lstm_forward_ref(params, root2)
    assert jnp.allclose(h2, h2_ref, atol=1e-4, rtol=1e-4)
    assert jnp.allclose(c2, c2_ref, atol=1e-4, rtol=1e-4)

    print("KERNEL_OK")
</pallas_src>

<mosaic_0001>
module attributes {stable_mosaic.version = 11 : i64} {
  func.func @_tree_kernel(%arg0: i32, %arg1: memref<8x32xf32, #tpu.memory_space<vmem>>, %arg2: memref<8x24xf32, #tpu.memory_space<vmem>>, %arg3: memref<64x128xf32, #tpu.memory_space<vmem>>, %arg4: memref<1x128xf32, #tpu.memory_space<vmem>>, %arg5: memref<8x128xf32, #tpu.memory_space<vmem>>, %arg6: memref<24x32xf32, #tpu.memory_space<vmem>>, %arg7: memref<24x32xf32, #tpu.memory_space<vmem>>) attributes {dimension_semantics = [#tpu.dimension_semantics<arbitrary>], iteration_bounds = array<i64: 3>, scalar_prefetch = 0 : i64, scratch_operands = 2 : i64, tpu.core_type = #tpu.core_type<tc>, window_params = [{transform_indices = @transform_0, window_bounds = array<i64: 8, 32>}, {transform_indices = @transform_1, window_bounds = array<i64: 8, 24>}, {pipeline_mode = #tpu.pipeline_mode<synchronous>, transform_indices = @transform_2, window_bounds = array<i64: 64, 128>}, {pipeline_mode = #tpu.pipeline_mode<synchronous>, transform_indices = @transform_3, window_bounds = array<i64: 1, 128>}, {transform_indices = @transform_4, window_bounds = array<i64: 8, 128>}]} {
    %c0_i32 = arith.constant 0 : i32
    %0 = arith.cmpi eq, %arg0, %c0_i32 : i32
    %1 = arith.extui %0 : i1 to i32
    %c0_i32_0 = arith.constant 0 : i32
    %2 = arith.cmpi ne, %1, %c0_i32_0 : i32
    scf.if %2 {
      %cst_22 = arith.constant 0.000000e+00 : f32
      %47 = vector.broadcast %cst_22 : f32 to vector<24x32xf32>
      %c0_23 = arith.constant 0 : index
      %c0_24 = arith.constant 0 : index
      %48 = vector.load %arg6[%c0_23, %c0_24] : memref<24x32xf32, #tpu.memory_space<vmem>>, vector<24x32xf32>
      tpu.vector_store %arg6[%c0_23, %c0_24], %47 {strides = array<i32>} : memref<24x32xf32, #tpu.memory_space<vmem>>, vector<24x32xf32>,
      %cst_25 = arith.constant 0.000000e+00 : f32
      %49 = vector.broadcast %cst_25 : f32 to vector<24x32xf32>
      %c0_26 = arith.constant 0 : index
      %c0_27 = arith.constant 0 : index
      %50 = vector.load %arg7[%c0_26, %c0_27] : memref<24x32xf32, #tpu.memory_space<vmem>>, vector<24x32xf32>
      tpu.vector_store %arg7[%c0_26, %c0_27], %49 {strides = array<i32>} : memref<24x32xf32, #tpu.memory_space<vmem>>, vector<24x32xf32>,
    } else {
    }
    %c0 = arith.constant 0 : index
    %c0_1 = arith.constant 0 : index
    %3 = vector.load %arg2[%c0, %c0_1] : memref<8x24xf32, #tpu.memory_space<vmem>>, vector<8x24xf32>
    %c0_2 = arith.constant 0 : index
    %c0_3 = arith.constant 0 : index
    %4 = vector.load %arg6[%c0_2, %c0_3] : memref<24x32xf32, #tpu.memory_space<vmem>>, vector<24x32xf32>
    %cst = arith.constant dense<0.000000e+00> : vector<8x32xf32>
    %5 = tpu.matmul %3, %4, %cst {dimension_numbers = #tpu.dot_dimension_numbers<[1], [0], [0], [1], [0, 0, 1, 1], [], []>} : vector<8x24xf32>, vector<24x32xf32>, vector<8x32xf32> -> vector<8x32xf32>
    %c0_4 = arith.constant 0 : index
    %c0_5 = arith.constant 0 : index
    %6 = vector.load %arg2[%c0_4, %c0_5] : memref<8x24xf32, #tpu.memory_space<vmem>>, vector<8x24xf32>
    %c0_6 = arith.constant 0 : index
    %c0_7 = arith.constant 0 : index
    %7 = vector.load %arg7[%c0_6, %c0_7] : memref<24x32xf32, #tpu.memory_space<vmem>>, vector<24x32xf32>
    %cst_8 = arith.constant dense<0.000000e+00> : vector<8x32xf32>
    %8 = tpu.matmul %6, %7, %cst_8 {dimension_numbers = #tpu.dot_dimension_numbers<[1], [0], [0], [1], [0, 0, 1, 1], [], []>} : vector<8x24xf32>, vector<24x32xf32>, vector<8x32xf32> -> vector<8x32xf32>
    %c0_9 = arith.constant 0 : index
    %c0_10 = arith.constant 0 : index
    %9 = vector.load %arg1[%c0_9, %c0_10] : memref<8x32xf32, #tpu.memory_space<vmem>>, vector<8x32xf32>
    %10 = tpu.concatenate %9, %5 in 1 : vector<8x32xf32>, vector<8x32xf32> -> vector<8x64xf32>
    %c0_11 = arith.constant 0 : index
    %c0_12 = arith.constant 0 : index
    %11 = vector.load %arg3[%c0_11, %c0_12] : memref<64x128xf32, #tpu.memory_space<vmem>>, vector<64x128xf32>
    %cst_13 = arith.constant dense<0.000000e+00> : vector<8x128xf32>
    %12 = tpu.matmul %10, %11, %cst_13 {dimension_numbers = #tpu.dot_dimension_numbers<[1], [0], [0], [1], [0, 0, 1, 1], [], []>} : vector<8x64xf32>, vector<64x128xf32>, vector<8x128xf32> -> vector<8x128xf32>
    %c0_14 = arith.constant 0 : index
    %c0_15 = arith.constant 0 : index
    %13 = vector.load %arg4[%c0_14, %c0_15] : memref<1x128xf32, #tpu.memory_space<vmem>>, vector<1x128xf32>
    %14 = vector.broadcast %13 : vector<1x128xf32> to vector<8x128xf32>
    %15 = arith.addf %12, %14 : vector<8x128xf32>
    %16 = tpu.iota {dimensions = array<i32: 1>} : vector<8x128xi32>
    %c64_i32 = arith.constant 64 : i32
    %17 = vector.broadcast %c64_i32 : i32 to vector<8x128xi32>
    %18 = arith.cmpi sge, %16, %17 : vector<8x128xi32>
    %c96_i32 = arith.constant 96 : i32
    %19 = vector.broadcast %c96_i32 : i32 to vector<8x128xi32>
    %20 = arith.cmpi slt, %16, %19 : vector<8x128xi32>
    %21 = arith.andi %18, %20 : vector<8x128xi1>
    %22 = math.tanh %15 : vector<8x128xf32>
    %23 = arith.negf %15 : vector<8x128xf32>
    %24 = math.exp %23 : vector<8x128xf32>
    %cst_16 = arith.constant 1.000000e+00 : f32
    %25 = vector.broadcast %cst_16 : f32 to vector<8x128xf32>
    %26 = arith.addf %25, %24 : vector<8x128xf32>
    %27 = arith.divf %25, %26 : vector<8x128xf32>
    %28 = arith.select %21, %22, %27 : vector<8x128xi1>, vector<8x128xf32>
    %29 = vector.extract_strided_slice %28 {offsets = [0, 0], sizes = [8, 32], strides = [1, 1]} : vector<8x128xf32> to vector<8x32xf32>
    %30 = vector.extract_strided_slice %28 {offsets = [0, 32], sizes = [8, 32], strides = [1, 1]} : vector<8x128xf32> to vector<8x32xf32>
    %31 = vector.extract_strided_slice %28 {offsets = [0, 64], sizes = [8, 32], strides = [1, 1]} : vector<8x128xf32> to vector<8x32xf32>
    %32 = vector.extract_strided_slice %28 {offsets = [0, 96], sizes = [8, 32], strides = [1, 1]} : vector<8x128xf32> to vector<8x32xf32>
    %33 = arith.mulf %29, %31 : vector<8x32xf32>
    %34 = arith.mulf %32, %8 : vector<8x32xf32>
    %35 = arith.addf %33, %34 : vector<8x32xf32>
    %36 = math.tanh %35 : vector<8x32xf32>
    %37 = arith.mulf %30, %36 : vector<8x32xf32>
    %c8_i32 = arith.constant 8 : i32
    %38 = arith.muli %arg0, %c8_i32 : i32
    %39 = tpu.assume_multiple %38, 8 : i32
    %40 = arith.index_cast %39 : i32 to index
    %c0_17 = arith.constant 0 : index
    %41 = vector.load %arg6[%40, %c0_17] : memref<24x32xf32, #tpu.memory_space<vmem>>, vector<8x32xf32>
    tpu.vector_store %arg6[%40, %c0_17], %37 {strides = array<i32>} : memref<24x32xf32, #tpu.memory_space<vmem>>, vector<8x32xf32>,
    %42 = arith.index_cast %39 : i32 to index
    %c0_18 = arith.constant 0 : index
    %43 = vector.load %arg7[%42, %c0_18] : memref<24x32xf32, #tpu.memory_space<vmem>>, vector<8x32xf32>
    tpu.vector_store %arg7[%42, %c0_18], %35 {strides = array<i32>} : memref<24x32xf32, #tpu.memory_space<vmem>>, vector<8x32xf32>,
    %cst_19 = arith.constant 0.000000e+00 : f32
    %44 = vector.broadcast %cst_19 : f32 to vector<8x64xf32>
    %45 = tpu.concatenate %37, %35, %44 in 1 : vector<8x32xf32>, vector<8x32xf32>, vector<8x64xf32> -> vector<8x128xf32>
    %c0_20 = arith.constant 0 : index
    %c0_21 = arith.constant 0 : index
    %46 = vector.load %arg5[%c0_20, %c0_21] : memref<8x128xf32, #tpu.memory_space<vmem>>, vector<8x128xf32>
    tpu.vector_store %arg5[%c0_20, %c0_21], %45 {strides = array<i32>} : memref<8x128xf32, #tpu.memory_space<vmem>>, vector<8x128xf32>,
    return
  }
  func.func @transform_0(%arg0: i32) -> (i32, i32) {
    %c0_i32 = arith.constant 0 : i32
    %c0_i32_0 = arith.constant 0 : i32
    return %arg0, %c0_i32 : i32, i32
  }
  func.func @transform_1(%arg0: i32) -> (i32, i32) {
    %c0_i32 = arith.constant 0 : i32
    %c0_i32_0 = arith.constant 0 : i32
    return %arg0, %c0_i32 : i32, i32
  }
  func.func @transform_2(%arg0: i32) -> (i32, i32) {
    %c0_i32 = arith.constant 0 : i32
    %c0_i32_0 = arith.constant 0 : i32
    %c0_i32_1 = arith.constant 0 : i32
    return %c0_i32, %c0_i32_0 : i32, i32
  }
  func.func @transform_3(%arg0: i32) -> (i32, i32) {
    %c0_i32 = arith.constant 0 : i32
    %c0_i32_0 = arith.constant 0 : i32
    %c0_i32_1 = arith.constant 0 : i32
    return %c0_i32, %c0_i32_0 : i32, i32
  }
  func.func @transform_4(%arg0: i32) -> (i32, i32) {
    %c0_i32 = arith.constant 0 : i32
    %c0_i32_0 = arith.constant 0 : i32
    return %arg0, %c0_i32 : i32, i32
  }
}

</mosaic_0001>

<bundles_post_ra>
// kernel: _tree_lstm_batched.1
= control target key start
LH: loop header
LB: loop body
LE: loop exit
PB: predicated region body
PF: predicated region fallthrough
CT: control target
= control target key end

     0   :  { %s1322_s0 = inlined_call_operand.hbm [shape: f32[24,32], index: 0, kind: input, shape index: {}]   ;;  %s1323_s1 = inlined_call_operand.hbm [shape: f32[24,24], index: 1, kind: input, shape index: {}]   ;;  %s1324_s2 = inlined_call_operand.hbm [shape: f32[64,128], index: 2, kind: input, shape index: {}]   ;;  %s1325_s3 = inlined_call_operand.vmem [shape: f32[1,128], index: 3, kind: input, shape index: {}]   ;;  %s1326_s4 = inlined_call_operand.hbm [shape: f32[24,128], index: 4, kind: output, shape index: {}]  }
   0x1   :  { %1331 = sst [smem:[#allocation15_spill]] %s1324_s2 }
   0x2   :  { %9 = vsyncpa [#allocation5], 0 }
   0x3   :  { %11 = vsyncpa [#allocation5 + $0x1], 0 }
   0x4   :  { %12 = vsyncpa [#allocation8], 0 }
   0x5   :  { %14 = vsyncpa [#allocation8 + $0x1], 0 }
   0x6   :  { %15 = vsyncpa [#allocation6], 0 }
   0x7   :  { %17 = vsyncpa [#allocation6 + $0x1], 0  ;;  %s1069_s15 = smov 0   ;;  %s1071_s16 = smov 0  }
   0x8   :  { %s1073_s17 = smov 0   ;;  %s1075_s18 = smov 0  }
   0x9 LB: > { %s1090_s19 = sadd.s32 4294967295, %s1029_s18   ;;  %s692_s20 = sadd.s32 4294967294, %s1029_s18   ;;  %s1029_s18 = sphi %s1075_s18, %s1350_s18   ;;  %s1025_s17 = sphi %s1073_s17, %s1349_s17   ;;  %s1021_s16 = sphi %s1071_s16, %s1348_s16   ;;  %s1017_s15 = sphi %s1069_s15, %s1347_s15  }
   0xa   : > { %p43_p0 = scmp.ne.s32.totalorder %s1021_s16, %s1017_s15  ;;  %p1327_p1 = scmp.eq.s32.totalorder %s1090_s19, 0 }
   0xb   : > { %p141_p3 = scmp.eq.s32.totalorder %s692_s20, 2  ;;  %p693_p5 = scmp.ge.s32.totalorder %s1029_s18, 1 }
   0xc   : > { %p1099_p4 = por %p1327_p1, %p43_p0  ;;  %p148_p7 = scmp.lt.s32.totalorder %s1029_s18, 4 }
   0xd   : > { %p1104_p6 = por %p141_p3, %p43_p0  ;;  %s1031_s24 = smov [#allocation9]  }
   0xe   : > { %s1332_s21 = scalar_select %p1099_p4, 1, 0 }
   0xf   : > { %s1333_s22 = scalar_select %p1104_p6, 1, 0 }
  0x10   : > { %p1110_p9 = pnand %p693_p5, %p148_p7  ;;  %s160_s25 = sshll.u32 %s1031_s24, 4  ;;  %s161_s25 = int_to_ptr.vmem [resolvable:$true] %s160_s25 }
  0x11   : > { %s1123_s27 = sadd.s32 1, %s1029_s18   ;;  %s30_s28 = sadd.s32 1, %s1025_s17 }
  0x12   : > { %s1334_s23 = scalar_select %p1110_p9, 1, 0 }
  0x13   : > { %p798_p10 = pneg %p1110_p9  ;;  %s27_s29 = ssub.s32 %s1029_s18, %s1123_s27 }
  0x14   : > { %s1336_s2 = sld [smem:[#allocation15_spill]] }
  0x15   : > { %p1118_p11 = pnand %p798_p10, %p1327_p1 }
  0x17   : > { %p869_p13 = pneg %p1118_p11 }
  0x1a   : > { %s867_s6 = scalar_lea.hbm %s1336_s2, 1024 }
  0x1b   : > { %p868_p12 = scmp.ne.s32.totalorder %s1336_s2, %s867_s6  ;;  %p874_p5 = scmp.lt.u32.totalorder %s867_s6, %s1336_s2 }
  0x1d   : > { %p870_p0 = pnand %p869_p13, %p868_p12 }
  0x1f   : > { %p871_p3 = pneg %p870_p0 }
  0x21   : > { %p876_p7 = pnand %p874_p5, %p871_p3 }
  0x23   : > { %879 = shalt.err (!%p876_p7)
}
  0x24   : > { %s880_s11 = scalar_lea.vmem %s161_s25, 1024  ;;  %p888_p2 = scmp.lt.s32.totalorder %s161_s25, %s161_s25 }
  0x25   : > { %p881_p10 = scmp.ne.s32.totalorder %s161_s25, %s880_s11  ;;  %p889_p6 = scmp.lt.s32.totalorder %s880_s11, %s880_s11 }
  0x27   : > { %p883_p8 = pnand %p881_p10, %p869_p13  ;;  %p890_p4 = por %p889_p6, %p888_p2 }
  0x29   : > { %p884_p1 = pneg %p883_p8 }
  0x2b   : > { %p891_p9 = pnand %p890_p4, %p884_p1 }
  0x2d   : > { %894 = shalt.err (!%p891_p9)
}
  0x2e   : > { %s1032_s12 = smov 128   ;;  %s1033_s13 = smov 8  }
  0x2f   : > { %801 = dma.hbm_to_vmem [thread:$0]  (!%p1118_p11), %s1336_s2, 1024, %s161_s25, [#allocation8], %s1032_s12, %s1032_s12, %s1033_s13  }
  0x30   : > { %p28_p8 = scmp.eq.s32.totalorder %s27_s29, 0  ;;  %p37_p2 = scmp.ne.s32.totalorder %s1025_s17, %s1021_s16 }
  0x31   : > { %p38_p1 = scmp.eq.s32.totalorder %s1029_s18, 0  ;;  %p814_p4 = scmp.lt.s32.totalorder %s1029_s18, 3 }
  0x32   : > { %s1149_s24 = scalar_select %p28_p8, %s1025_s17, %s30_s28  }
  0x33   : > { %p39_p6 = por %p38_p1, %p37_p2  ;;  %p1337_p9 = scmp.eq.s32.totalorder %s1090_s19, 2 }
  0x34   : > { %s177_s5 = sand.u32 1, %s1025_s17   ;;  %s697_s6 = sshll.u32 %s1029_s18, 7 }
  0x35   : > { %p1153_p12 = por %p1337_p9, %p37_p2  ;;  %s1159_s7 = sshll.u32 %s177_s5, 3 }
  0x36   : > { %s1164_s25 = scalar_lea.hbm %s1322_s0, %s697_s6  ;;  %s181_s28 = scalar_lea.vmem [#allocation4], %s1159_s7 }
  0x37   : > { %s1338_s30 = scalar_select %p1153_p12, 1, 0 }
  0x38   : > { %s188_s29 = sshll.u32 %s181_s28, 4  ;;  %p1167_p11 = pnand %p814_p4, %p39_p6  ;;  %s1171_s29 = int_to_ptr.vmem [resolvable:$true] %s188_s29 }
  0x39   : > { %s1176_s12 = scalar_lea.hbm %s1323_s1, %s697_s6  ;;  %s178_s13 = scalar_lea.sflag [#allocation5], %s177_s5 }
  0x3a   : > { %s895_s14 = scalar_lea.hbm %s1164_s25, 128  ;;  %p897_p0 = pneg %p1167_p11 }
  0x3b   : > { %p896_p13 = scmp.ne.s32.totalorder %s1164_s25, %s895_s14  ;;  %s900_s8 = scalar_lea.hbm %s1322_s0, 384 }
  0x3c   : > { %p901_p7 = scmp.lt.u32.totalorder %s1164_s25, %s1322_s0  ;;  %p902_p10 = scmp.lt.u32.totalorder %s900_s8, %s895_s14 }
  0x3d   : > { %p898_p3 = pnand %p897_p0, %p896_p13  ;;  %p904_p2 = scmp.lt.u32.totalorder %s895_s14, %s1164_s25 }
  0x3e   : > { %p903_p8 = por %p902_p10, %p901_p7 }
  0x3f   : > { %p899_p5 = pneg %p898_p3 }
  0x40   : > { %p905_p1 = por %p904_p2, %p903_p8 }
  0x42   : > { %p906_p4 = pnand %p905_p1, %p899_p5 }
  0x44   : > { %909 = shalt.err (!%p906_p4)
}
  0x45   : > { %s910_s5 = scalar_lea.vmem %s1171_s29, 128  ;;  %s1034_s6 = smov [#allocation4]  }
  0x46   : > { %p911_p6 = scmp.ne.s32.totalorder %s1171_s29, %s910_s5  ;;  %s915_s10 = sshll.u32 %s1034_s6, 4  ;;  %s916_s10 = int_to_ptr.vmem [resolvable:$false] %s915_s10 }
  0x47   : > { %s917_s2 = scalar_lea.vmem %s916_s10, 256  ;;  %p918_p3 = scmp.lt.s32.totalorder %s1171_s29, %s916_s10 }
  0x48   : > { %p913_p9 = pnand %p911_p6, %p897_p0  ;;  %p919_p7 = scmp.lt.s32.totalorder %s917_s2, %s910_s5 }
  0x4a   : > { %p914_p13 = pneg %p913_p9  ;;  %p920_p10 = por %p919_p7, %p918_p3 }
  0x4c   : > { %p921_p8 = pnand %p920_p10, %p914_p13 }
  0x4e   : > { %924 = shalt.err (!%p921_p8)
}
  0x4f   : > { %805 = dma.hbm_to_vmem [thread:$0]  (!%p1167_p11), %s1164_s25, 128, %s1171_s29, %s178_s13  }
  0x50   : > { %s195_s11 = sand.u32 1, %s1029_s18   ;;  %s199_s14 = scalar_lea.vmem [#allocation7], %s1159_s7 }
  0x51   : > { %s206_s20 = sshll.u32 %s199_s14, 4  ;;  %s196_s26 = scalar_lea.sflag [#allocation8], %s195_s11  ;;  %s207_s20 = int_to_ptr.vmem [resolvable:$true] %s206_s20 }
  0x52   : > { %s925_s8 = scalar_lea.hbm %s1176_s12, 128  ;;  %s930_s6 = scalar_lea.hbm %s1323_s1, 384 }
  0x53   : > { %p926_p5 = scmp.ne.s32.totalorder %s1176_s12, %s925_s8  ;;  %p931_p4 = scmp.lt.u32.totalorder %s1176_s12, %s1323_s1 }
  0x54   : > { %p932_p6 = scmp.lt.u32.totalorder %s930_s6, %s925_s8  ;;  %p934_p13 = scmp.lt.u32.totalorder %s925_s8, %s1176_s12 }
  0x55   : > { %p928_p2 = pnand %p926_p5, %p897_p0 }
  0x56   : > { %p933_p9 = por %p932_p6, %p931_p4 }
  0x57   : > { %p929_p1 = pneg %p928_p2 }
  0x58   : > { %p935_p3 = por %p934_p13, %p933_p9 }
  0x5a   : > { %p936_p7 = pnand %p935_p3, %p929_p1 }
  0x5c   : > { %939 = shalt.err (!%p936_p7)
}
  0x5d   : > { %s940_s7 = scalar_lea.vmem %s207_s20, 128  ;;  %s1035_s25 = smov [#allocation7]  }
  0x5e   : > { %p941_p10 = scmp.ne.s32.totalorder %s207_s20, %s940_s7  ;;  %s945_s29 = sshll.u32 %s1035_s25, 4  ;;  %s946_s29 = int_to_ptr.vmem [resolvable:$false] %s945_s29 }
  0x5f   : > { %s947_s13 = scalar_lea.vmem %s946_s29, 256  ;;  %p948_p2 = scmp.lt.s32.totalorder %s207_s20, %s946_s29 }
  0x60   : > { %p943_p8 = pnand %p941_p10, %p897_p0  ;;  %p949_p12 = scmp.lt.s32.totalorder %s947_s13, %s940_s7 }
  0x62   : > { %p944_p5 = pneg %p943_p8  ;;  %p950_p4 = por %p949_p12, %p948_p2 }
  0x64   : > { %p951_p6 = pnand %p950_p4, %p944_p5 }
  0x66   : > { %954 = shalt.err (!%p951_p6)
}
  0x67   : > { %808 = dma.hbm_to_vmem [thread:$0]  (!%p1167_p11), %s1176_s12, 128, %s207_s20, %s196_s26  }
  0x68   : > { %p1340_p1 = scmp.ne.s32.totalorder %s1334_s23, 0 }
  0x69   : > { %s1227_s11 = sand.u32 (!%p1340_p1), 1, %s1021_s16   ;;  %p1341_p12 = scmp.ne.s32.totalorder (!%p1340_p1), %s1332_s21, 0 }
  0x6a   : > { %215 = sbr.rel (%p1340_p1) target bundleno = 1086 (0x43e), region = 36  ;;  %s1230_s14 = sshll.u32 (!%p1340_p1), %s1227_s11, 3 }
  0x6b   : > { %s218_s8 = scalar_lea.sflag (!%p1340_p1), [#allocation5], %s1227_s11  ;;  %s221_s28 = scalar_lea.vmem (!%p1340_p1), [#allocation4], %s1230_s14 }
  0x71   : > { %1000 = dma.done.wait (%p1341_p12), %s218_s8, 128  }
  0x72   : > { %1002 = vsyncadd (%p1341_p12), %s218_s8, 4294967168  ;;  %s226_s23 = sand.u32 1, %s1090_s19   ;;  %s230_s12 = scalar_lea.vmem [#allocation7], %s1230_s14 }
  0x73   : > { %s227_s9 = scalar_lea.sflag [#allocation8], %s226_s23 }
  0x74   : > { %1004 = dma.done.wait (%p1341_p12), %s227_s9, 128  }
  0x75   : > { %1006 = vsyncadd (%p1341_p12), %s227_s9, 4294967168  ;;  %p1342_p11 = scmp.eq.s32.totalorder %s1090_s19, 0 }
  0x77   : > { %1008 = dma.done.wait (%p1342_p11), [#allocation8], 1024   ;;  %p1343_p0 = pmov %p1342_p11 }
  0x78   : > { %s263_s20 = scalar_lea.vmem [#allocation10], %s1230_s14  ;;  %p1344_p9 = scmp.ne.s32.totalorder %s1090_s19, 0 }
  0x79   : > { %1010 = vsyncadd (%p1343_p0), [#allocation8], 4294966272  ;;  %vm268_vm0 = vcmask (!%p1344_p9), 261120   ;;  %v1036_v0 = vmov (!%p1344_p9), 0.0  }
  0x7a   : > { %267 = sbr.rel (%p1344_p9) target bundleno = 129 (0x81), region = 52  ;;  %269 = vst.msk [vmem:[#allocation2] sm:$0xff] (!%p1344_p9), %vm268_vm0, %v1036_v0  ;;  %270 = vst.msk [vmem:[#allocation2 + $0x8] sm:$0xff] (!%p1344_p9), %vm268_vm0, %v1036_v0 }
  0x7b   : > { %271 = vst.msk [vmem:[#allocation2 + $0x10] sm:$0xff] (!%p1344_p9), %vm268_vm0, %v1036_v0  ;;  %272 = vst.msk [vmem:[#allocation3] sm:$0xff] (!%p1344_p9), %vm268_vm0, %v1036_v0 }
  0x7c   : > { %273 = vst.msk [vmem:[#allocation3 + $0x8] sm:$0xff] (!%p1344_p9), %vm268_vm0, %v1036_v0  ;;  %274 = vst.msk [vmem:[#allocation3 + $0x10] sm:$0xff] (!%p1344_p9), %vm268_vm0, %v1036_v0 }
  0x81 PF: > { %v276_v1 = vld [vmem:[#allocation2] sm:$0xff]  ;;  %v277_v2 = vld [vmem:[#allocation2 + $0x8] sm:$0xff]  ;;  %v1037_v3 = vmov 0.0|0.0   ;;  %vm1038_vm1 = vmmov 0   ;;  %v1039_v5 = vmov 0.0   ;;  %vm279_vm2 = vcmask 195584  }
  0x82   : > { %770 = vmatprep.subr.bf16.mxu1 %v1037_v3  ;;  %v771_v4 = vpack.c.bf16 %v277_v2, %v276_v1  ;;  %739 = vmatprep.mubr.msk.f32.mxu1 %vm1038_vm1, %v1039_v5  ;;  %v278_v6 = vld [vmem:[#allocation2 + $0x10] sm:$0xff]  ;;  %v275_v7 = vld [vmem:[%s230_s12] sm:$0xff]  ;;  %v353_v8 = vld [vmem:[#allocation3] sm:$0xff]  ;;  %s1040_s21 = smov 32   ;;  %s1041_s26 = smov 96   ;;  %vm431_vm3 = vcmask 261120   ;;  %v522_v37 = vlaneseq }
  0x83   : > { %776 = vmatprep.subr.bf16.mxu0 %v1037_v3  ;;  %767 = vmatprep.mubr.msk.f32.mxu0 %vm1038_vm1, %v1039_v5  ;;  %v354_v9 = vld [vmem:[#allocation3 + $0x8] sm:$0xff]  ;;  %v433_v11 = vld [vmem:[#allocation9] sm:$0xff]  ;;  %v434_v12 = vld [vmem:[#allocation9 + $0x8] sm:$0xff]  ;;  %vm448_vm4 = vcmask 523264   ;;  %s1042_s10 = smov 64   ;;  %s711_s2 = sshll.u32 %s1090_s19, 3 }
  0x84   : > { %772 = vmatpush3.bf16.msra.mxu1 %v771_v4  ;;  %v774_v10 = vpack.c.bf16 %v354_v9, %v353_v8  ;;  %v435_v13 = vld [vmem:[#allocation9 + $0x10] sm:$0xff]  ;;  %v777_v14 = vpack.c.bf16 %v434_v12, %v433_v11  ;;  %v436_v15 = vld [vmem:[#allocation9 + $0x18] sm:$0xff]  ;;  %v437_v18 = vld [vmem:[#allocation9 + $0x20] sm:$0xff]  ;;  %v523_v39 = vand.u32 127, %v522_v37  ;;  %s563_s7 = scalar_lea.vmem [#allocation3], %s711_s2  ;;  %s713_s25 = sshll.u32 %s1090_s19, 7 }
  0x85   : > { %737 = vmatprep.subr.mxu1 %v1039_v5  ;;  %v355_v16 = vld [vmem:[#allocation3 + $0x10] sm:$0xff]  ;;  %v780_v17 = vpack.c.bf16 %v436_v15, %v435_v13  ;;  %v438_v19 = vld [vmem:[#allocation9 + $0x28] sm:$0xff]  ;;  %v439_v21 = vld [vmem:[#allocation9 + $0x30] sm:$0xff]  ;;  %s586_s29 = sshll.u32 %s263_s20, 4  ;;  %s561_s13 = scalar_lea.vmem [#allocation2], %s711_s2  ;;  %s1278_s29 = int_to_ptr.vmem [resolvable:$true] %s586_s29 }
  0x86   : > { %778 = vmatpush3.bf16.msra.mxu0 %v777_v14  ;;  %v783_v20 = vpack.c.bf16 %v438_v19, %v437_v18  ;;  %v440_v22 = vld [vmem:[#allocation9 + $0x38] sm:$0xff]  ;;  %v426_v28 = vld [vmem:[%s221_s28] sm:$0xff]  ;;  %v708_v31 = vld [vmem:[%s1325_s3] ss:$0 sm:$0xff]  ;;  %vm524_vm5 = vcmp.ge.s32.totalorder %v523_v39, 64  ;;  %vm525_vm6 = vcmp.lt.s32.totalorder %v523_v39, 96  ;;  %s1276_s23 = scalar_lea.hbm %s1326_s4, %s713_s25 }
  0x87   : > { %779 = vmatprep.subr.bf16.mxu0 %v1037_v3  ;;  %v786_v23 = vpack.c.bf16 %v440_v22, %v439_v21  ;;  %vm526_vm7 = vmand %vm524_vm5, %vm525_vm6  ;;  %s573_s19 = scalar_lea.sflag [#allocation6], %s1227_s11  ;;  %s955_s9 = scalar_lea.vmem %s1278_s29, 128 }
  0x88   : > { %738 = vmatpush3.msra.mxu1 %v278_v6  ;;  %p956_p13 = scmp.ne.s32.totalorder %s1278_s29, %s955_s9  ;;  %p1345_p3 = scmp.ne.s32.totalorder %s1338_s30, 0 }
  0x89   : > { %740 = vmatmul.mubr.msk.f32.vlgmr.msra.gmra.mrb[0].mxu1 %vm279_vm2, %v275_v7  ;;  %773 = vmatprep.subr.bf16.mxu1 %v1037_v3  ;;  %s1043_s12 = smov [#allocation10]  }
  0x8a   : > { %748 = vmatprep.mubr.msk.f32.mxu1 %vm1038_vm1, %v1039_v5  ;;  %775 = vmatpush3.bf16.msra.mxu1 %v774_v10  ;;  %p957_p7 = pnand %p956_p13, %p1345_p3 }
  0x8b   : > { %746 = vmatprep.subr.mxu1 %v1039_v5  ;;  %781 = vmatpush3.bf16.msra.mxu0 %v780_v17 }
  0x8c   : > { %782 = vmatprep.subr.bf16.mxu0 %v1037_v3  ;;  %p958_p10 = pneg %p957_p7 }
  0x8e   : > { %747 = vmatpush3.msra.mxu1 %v355_v16 }
  0x8f   : > { %749 = vmatmul.mubr.msk.f32.vlgmr.msra.gmra.mrb[2].mxu1 %vm279_vm2, %v275_v7  ;;  %784 = vmatpush3.bf16.msra.mxu0 %v783_v20 }
  0x90   : > { %785 = vmatprep.subr.bf16.mxu0 %v1037_v3 }
  0x93   : > { %787 = vmatpush3.bf16.msra.mxu0 %v786_v23 }
 0x15c   : > { %v349_v24 = vpop.f32.mrb[0].mxu1 }
 0x15d   : > { %428 = vrot.lane.b32.xlu0 %v349_v24, %s1040_s21  ;;  %v741_v25 = vpop.f32.mrb[1].mxu1 }
 0x162   : > { %v422_v26 = vpop.f32.mrb[2].mxu1 }
 0x163   : > { %541 = vrot.lane.b32.xlu0 %v422_v26, %s1041_s26  ;;  %v750_v27 = vpop.f32.mrb[3].mxu1 }
 0x1cf   : > { %v429_v29 = vpop.permute.xlu0 %428 }
 0x1d0   : > { %v432_v30 = vsel %vm431_vm3, %v426_v28, %v429_v29 }
 0x1d1   : > { %768 = vmatmul.mubr.msk.f32.vlgmr.msra.gmra.mrb[0].mxu0 %vm448_vm4, %v432_v30 }
 0x1d5   : > { %v542_v43 = vpop.permute.xlu0 %541 }
 0x2a4   : > { %v518_v32 = vpop.f32.mrb[0].mxu0 }
 0x2a5   : > { %v519_v33 = vadd.f32 %v708_v31, %v518_v32  ;;  %v769_v34 = vpop.f32.mrb[1].mxu0 }
 0x2a7   : > { %v710_v35 = vmul.f32 -1.442695, %v519_v33 }
 0x2a9   : > { %859 = vpow2.f32 %v710_v35 }
 0x2aa   : > { %861 = vtanh.f32 %v519_v33 }
 0x2b3   : > { %v860_v36 = vpop.eup %859 }
 0x2b4   : > { %v531_v38 = vadd.f32 1.0, %v860_v36  ;;  %v862_v40 = vpop.eup %861 }
 0x2b6   : > { %863 = vrcp.f32 %v531_v38 }
 0x2c0   : > { %v864_v41 = vpop.eup %863 }
 0x2c1   : > { %v534_v42 = vsel %vm526_vm7, %v862_v40, %v864_v41 }
 0x2c2   : > { %536 = vrot.lane.b32.xlu1 %v534_v42, %s1042_s10  ;;  %v544_v44 = vmul.f32 %v542_v43, %v534_v42 }
 0x2c6   : > { %546 = vrot.lane.b32.xlu1 %v544_v44, %s1040_s21 }
 0x334   : > { %v537_v45 = vpop.permute.xlu1 %536 }
 0x335   : > { %v539_v46 = vmul.f32 %v537_v45, %v534_v42 }
 0x338   : > { %v547_v47 = vpop.permute.xlu1 %546 }
 0x339   : > { %v549_v48 = vadd.f32 %v547_v47, %v539_v46 }
 0x33b   : > { %865 = vtanh.f32 %v549_v48  ;;  %564 = vst.msk [vmem:[%s563_s7] sm:$0xff] %vm431_vm3, %v549_v48 }
 0x345   : > { %v866_v49 = vpop.eup %865 }
 0x346   : > { %552 = vrot.lane.b32.xlu0 %v866_v49, %s1040_s21 }
 0x34a   : > { %566 = vrot.lane.b32.xlu0 %v549_v48, %s1040_s21  ;;  %s959_s21 = sshll.u32 %s1043_s12, 4  ;;  %s960_s21 = int_to_ptr.vmem [resolvable:$false] %s959_s21 }
 0x34b   : > { %p962_p8 = scmp.lt.s32.totalorder %s1278_s29, %s960_s21 }
 0x3b8   : > { %v553_v50 = vpop.permute.xlu0 %552 }
 0x3b9   : > { %v555_v51 = vmul.f32 %v553_v50, %v534_v42 }
 0x3bb   : > { %558 = vrot.lane.b32.xlu1 %v555_v51, %s1041_s26  ;;  %s961_s26 = scalar_lea.vmem %s960_s21, 256 }
 0x3bc   : > { %v567_v52 = vpop.permute.xlu0 %566  ;;  %p963_p5 = scmp.lt.s32.totalorder %s961_s26, %s955_s9 }
 0x3be   : > { %p964_p2 = por %p963_p5, %p962_p8 }
 0x3c0   : > { %p965_p4 = pnand %p964_p2, %p958_p10 }
 0x42d   : > { %v559_v53 = vpop.permute.xlu1 %558 }
 0x42e   : > { %562 = vst.msk [vmem:[%s561_s13] sm:$0xff] %vm431_vm3, %v559_v53  ;;  %v569_v54 = vsel %vm431_vm3, %v559_v53, %v567_v52 }
 0x42f   : > { %v570_v55 = vsel %vm448_vm4, %v569_v54, 0.0 }
 0x430   : > { %571 = vst [vmem:[%s263_s20] sm:$0xff] %v570_v55 }
 0x431   : > { %968 = shalt.err (!%p965_p4)
}
 0x432   : > { %s969_s11 = scalar_lea.hbm %s1276_s23, 128  ;;  %s973_s5 = scalar_lea.hbm %s1326_s4, 384 }
 0x433   : > { %p970_p6 = scmp.ne.s32.totalorder %s1276_s23, %s969_s11  ;;  %p974_p11 = scmp.lt.u32.totalorder %s1276_s23, %s1326_s4 }
 0x434   : > { %p975_p0 = scmp.lt.u32.totalorder %s973_s5, %s969_s11  ;;  %p977_p13 = scmp.lt.u32.totalorder %s969_s11, %s1276_s23 }
 0x435   : > { %p971_p1 = pnand %p970_p6, %p1345_p3 }
 0x436   : > { %p976_p9 = por %p975_p0, %p974_p11 }
 0x437   : > { %p972_p12 = pneg %p971_p1 }
 0x438   : > { %p978_p7 = por %p977_p13, %p976_p9 }
 0x43a   : > { %p979_p10 = pnand %p978_p7, %p972_p12 }
 0x43c   : > { %982 = shalt.err (!%p979_p10)
}
 0x43d   : > { %796 = dma.vmem_to_hbm [thread:$0]  (%p1345_p3), %s1278_s29, 128, %s1276_s23, %s573_s19  }
 0x43e PF: > { %p816_p8 = scmp.ge.s32.totalorder %s1029_s18, 2  ;;  %s598_s2 = sand.u32 1, %s1017_s15  }
 0x43f   : > { %p1346_p5 = scmp.ne.s32.totalorder %s1333_s22, 0  ;;  %s599_s7 = scalar_lea.sflag [#allocation6], %s598_s2 }
 0x441   : > { %p810_p2 = pnand %p816_p8, %p1346_p5 }
 0x443   : > { %1012 = dma.done.wait (!%p810_p2), %s599_s7, 128  }
 0x444   : > { %1014 = vsyncadd (!%p810_p2), %s599_s7, 4294967168  ;;  %p20_p4 = scmp.ge.s32.totalorder %s1123_s27, 5   ;;  %s1347_s15 = smov %s1021_s16 }
 0x445   : > { %s1348_s16 = smov %s1025_s17  ;;  %s1349_s17 = smov %s1149_s24 }
 0x446   : > { %s1350_s18 = smov %s1123_s27  ;;  %22 = sbr.rel (!%p20_p4) target bundleno = 9 (0x9), region = 104 }
 0x44d   :  { %604 = vsyncpa [#allocation5], 1 }
 0x44e   :  { %606 = vsyncpa [#allocation5 + $0x1], 1 }
 0x44f   :  { %607 = vsyncpa [#allocation8], 1 }
 0x450   :  { %609 = vsyncpa [#allocation8 + $0x1], 1 }
 0x451   :  { %610 = vsyncpa [#allocation6], 1 }
 0x452   :  { %612 = vsyncpa [#allocation6 + $0x1], 1 }

</bundles_post_ra>
